<compile_context>
chip_gen: v7x
topology: tpu7x:2x2x1
jax: 0.10.0
libtpu: 0.0.40
codegen_flags: <defaults>
</compile_context>

<pallas_src>
import functools

import jax
import jax.numpy as jnp
from jax import lax
from jax.experimental import pallas as pl
from jax.experimental.pallas import tpu as pltpu


def _pow_half(sq, half_p, approx, newton_iters):
    """sq ** half_p.  Integer half_p -> reciprocal + exponentiation-by-squaring
    (pure VPU multiplies, one EUP reciprocal + optional Newton refinement);
    otherwise generic pow."""
    if float(half_p).is_integer():
        e = int(abs(half_p))
        if e == 0:
            return jnp.ones_like(sq)
        if half_p < 0:
            base = pl.reciprocal(sq, approx=approx)
            if approx:
                for _ in range(newton_iters):
                    # One Newton step: err eps -> eps^2; 2 mul + 1 sub on VPU.
                    base = base * (2.0 - sq * base)
        else:
            base = sq
        result = None
        acc = base
        while e:
            if e & 1:
                result = acc if result is None else result * acc
            e >>= 1
            if e:
                acc = acc * acc
        return result
    return sq ** jnp.float32(half_p)


def _proto_cf_loss_kernel(x_ref, p2t_ref, psq_ref, cls0_ref, is_one_ref, out_ref,
                          *, n_total, half_p, scale, approx_recip, newton_iters):
    tn = x_ref.shape[0]
    x = x_ref[...]                                     # (tn, D), input dtype
    xf = x.astype(jnp.float32)
    xsq = jnp.sum(xf * xf, axis=1, keepdims=True)      # (tn, 1)

    # Fused Gram term for both classes: x @ (2 P)^T -> (tn, 2M) on the MXU.
    xp2 = jnp.dot(x, p2t_ref[...], preferred_element_type=jnp.float32)
    sq = xsq + psq_ref[...] - xp2                      # squared distances

    # Ragged last tile: rows beyond n_total hold HBM garbage -> sanitize
    # before the pow chain, then zero their contribution at the end.
    ragged = (n_total % tn) != 0
    if ragged:
        row = pl.program_id(0) * tn + lax.broadcasted_iota(jnp.int32, (tn, 1), 0)
        valid = row < n_total                          # (tn, 1) bool
        sq = jnp.where(valid, sq, 1.0)
    # Tiny positive clamp: exact x==prototype gives sq^-5 -> inf -> logit 0
    # (same as the PyTorch f32 path) without producing NaN in the Newton step.
    sq = jnp.maximum(sq, 1e-30)

    # d^p = sq^(p/2); for p = -10: one EUP reciprocal (+Newton) + VPU squarings.
    powd = _pow_half(sq, half_p, approx_recip, newton_iters)   # (tn, 2M)

    # Class split via resident 0/1 mask (exact masked reduce for both classes).
    cls0 = cls0_ref[...]                               # (1, 2M) float {0, 1}
    s0 = jnp.sum(powd * cls0, axis=1, keepdims=True)
    s1 = jnp.sum(powd * (1.0 - cls0), axis=1, keepdims=True)

    inv_p = 1.0 / (2.0 * half_p)                       # == 1/norm
    logit0 = -(s0 ** inv_p)                            # (tn, 1)
    logit1 = -(s1 ** inv_p)                            # (tn, 1)

    # 2-class cross entropy, closed form:
    #   lse - picked = softplus((1 - 2*y) * (logit1 - logit0))
    is_one = is_one_ref[...]                           # (tn, 1) float {0, 1}
    t = (1.0 - 2.0 * is_one) * (logit1 - logit0)
    per_row = jnp.maximum(t, 0.0) + jnp.log(1.0 + jnp.exp(-jnp.abs(t)))
    if ragged:
        per_row = jnp.where(valid, per_row, 0.0)

    # Mean over the full batch is folded into `scale` (= w / N).
    partial = scale * jnp.sum(per_row)

    # Lane-dense (1,1,128) per-tile partial; one tiny XLA sum outside finishes.
    out_ref[...] = jnp.full(out_ref.shape, partial, dtype=jnp.float32)


def _round_up(x, m):
    return -(-x // m) * m


def _cdiv(a, b):
    return -(-a // b)


def _vmem_limit_bytes():
    """Scoped VMEM limit adapted to the chip: ~48 MiB on v7x (64 MiB physical),
    up to 96 MiB on v5e/v6e (128 MiB physical)."""
    try:
        phys = int(pltpu.get_tpu_info().vmem_capacity_bytes)
    except Exception:
        phys = 64 << 20      # conservative (v7x per-core VMEM)
    return int(max(32 << 20, min(phys - (16 << 20), 96 << 20)))


def _pick_tile(n, d, itemsize, preferred, vmem_limit):
    """Pick an N-tile: as large as `preferred` allows, capped so the
    double-buffered x tile stays well inside the VMEM budget, floored to a
    multiple of 8 (sublane), and small enough to give >= 2 grid steps so v7x
    megacore parallel sharding has work for both TensorCores."""
    budget = vmem_limit // 4                       # headroom for p2t/psq/out/scratch
    cap = max(8, (budget // (2 * d * itemsize)) // 8 * 8)
    tn = min(int(preferred), cap, _round_up(n, 8))
    tn = max(8, (tn // 8) * 8)
    while tn > 8 and _cdiv(n, tn) < 2:
        tn = max(8, (tn // 2 // 8) * 8)
    return tn


def proto_cf_loss(x, tf_prototypes, labels, *, w=1.0, norm=-10.0,
                  block_n=512, approx_reciprocal=True, newton_iters=1):
    """x: (N, D) float; tf_prototypes: (2, M, D) float; labels: (N,) int {0,1}."""
    n, d = x.shape
    n_cls, m, d2 = tf_prototypes.shape
    assert n_cls == 2 and d2 == d

    vmem_limit = _vmem_limit_bytes()
    tn = _pick_tile(n, d, jnp.dtype(x.dtype).itemsize, block_n, vmem_limit)
    grid = _cdiv(n, tn)
    n_pad = grid * tn

    # Prototype-side precompute (done once in XLA, reused by every tile).
    p_all = tf_prototypes.reshape(2 * m, d)                   # (2M, D)
    p2t = jnp.transpose(p_all * 2.0)                          # (D, 2M) = 2*P^T
    psq = jnp.sum(p_all.astype(jnp.float32) ** 2, axis=1).reshape(1, 2 * m)
    cls0_mask = (jnp.arange(2 * m) < m).astype(jnp.float32).reshape(1, 2 * m)

    # Label mask (0/1 float), padded to the gridded length so the ragged last
    # tile never reads garbage labels.
    is_one = (labels == 1).astype(jnp.float32)
    if n_pad != n:
        is_one = jnp.pad(is_one, (0, n_pad - n))
    is_one = is_one.reshape(n_pad, 1)

    kernel = functools.partial(
        _proto_cf_loss_kernel,
        n_total=n,
        half_p=float(norm) / 2.0,
        scale=float(w) / float(n),
        approx_recip=approx_reciprocal,
        newton_iters=int(newton_iters))

    partials = pl.pallas_call(
        kernel,
        out_shape=jax.ShapeDtypeStruct((grid, 1, 128), jnp.float32),
        grid=(grid,),
        in_specs=[
            pl.BlockSpec((tn, d), lambda i: (i, 0)),          # x tile (streamed)
            pl.BlockSpec((d, 2 * m), lambda i: (0, 0)),       # 2*P^T (resident)
            pl.BlockSpec((1, 2 * m), lambda i: (0, 0)),       # ||p||^2 (resident)
            pl.BlockSpec((1, 2 * m), lambda i: (0, 0)),       # class-0 mask (resident)
            pl.BlockSpec((tn, 1), lambda i: (i, 0)),          # label mask tile
        ],
        out_specs=pl.BlockSpec((1, 1, 128), lambda i: (i, 0, 0)),
        compiler_params=pltpu.CompilerParams(
            dimension_semantics=("parallel",),
            vmem_limit_bytes=vmem_limit),
    )(x, p2t, psq, cls0_mask, is_one)

    # Each block holds its broadcast partial sum; reduce over tiles.
    return jnp.sum(partials[:, 0, 0])


def _reference(x, tf_prototypes, labels, w=1.0, norm=-10.0):
    # Pure-JAX reference mirroring the PyTorch forward (for sanity checking).
    def pdist(a, b):
        diff = a[:, None, :] - b[None, :, :]
        return jnp.sqrt(jnp.sum(diff * diff, axis=-1))

    d0 = pdist(x, tf_prototypes[0])
    d1 = pdist(x, tf_prototypes[1])
    l0 = -(jnp.sum(jnp.abs(d0) ** norm, axis=1) ** (1.0 / norm))
    l1 = -(jnp.sum(jnp.abs(d1) ** norm, axis=1) ** (1.0 / norm))
    logits = jnp.stack([l0, l1], axis=1)
    lse = jax.scipy.special.logsumexp(logits, axis=1)
    picked = jnp.take_along_axis(logits, labels[:, None], axis=1)[:, 0]
    return w * jnp.mean(lse - picked)


if __name__ == "__main__":
    key = jax.random.PRNGKey(0)
    k1, k2, k3 = jax.random.split(key, 3)

    N, D, M = 30, 32, 4          # batch (ragged vs tile), feature dim, protos/class
    W, NORM = 0.5, -10.0

    x = jax.random.normal(k1, (N, D), dtype=jnp.float32)
    tf_prototypes = jax.random.normal(k2, (2, M, D), dtype=jnp.float32)
    labels = jax.random.randint(k3, (N,), 0, 2, dtype=jnp.int32)

    ref = _reference(x, tf_prototypes, labels, w=W, norm=NORM)

    # Small explicit tile: exercises the multi-step N grid AND the ragged
    # last tile (30 rows, tn=8 -> 4 tiles, 6 valid rows in the last one).
    loss_small = jax.block_until_ready(
        proto_cf_loss(x, tf_prototypes, labels, w=W, norm=NORM, block_n=8))
    # Default large-tile / auto-capped path.
    loss_auto = jax.block_until_ready(
        proto_cf_loss(x, tf_prototypes, labels, w=W, norm=NORM))

    # Newton-refined approx reciprocal -> tight tolerance vs. the reference.
    assert jnp.allclose(loss_small, ref, rtol=2e-3, atol=1e-4), (loss_small, ref)
    assert jnp.allclose(loss_auto, ref, rtol=2e-3, atol=1e-4), (loss_auto, ref)

    print("KERNEL_OK")
</pallas_src>

<mosaic_0001>
module attributes {stable_mosaic.version = 11 : i64} {
  func.func @_proto_cf_loss_kernel(%arg0: i32, %arg1: memref<8x32xf32, #tpu.memory_space<vmem>>, %arg2: memref<32x8xf32, #tpu.memory_space<vmem>>, %arg3: memref<1x8xf32, #tpu.memory_space<vmem>>, %arg4: memref<1x8xf32, #tpu.memory_space<vmem>>, %arg5: memref<8x1xf32, #tpu.memory_space<vmem>>, %arg6: memref<1x1x128xf32, #tpu.memory_space<vmem>>) attributes {dimension_semantics = [#tpu.dimension_semantics<parallel>], iteration_bounds = array<i64: 4>, scalar_prefetch = 0 : i64, scratch_operands = 0 : i64, tpu.core_type = #tpu.core_type<tc>, window_params = [{transform_indices = @transform_0, window_bounds = array<i64: 8, 32>}, {pipeline_mode = #tpu.pipeline_mode<synchronous>, transform_indices = @transform_1, window_bounds = array<i64: 32, 8>}, {pipeline_mode = #tpu.pipeline_mode<synchronous>, transform_indices = @transform_2, window_bounds = array<i64: 1, 8>}, {pipeline_mode = #tpu.pipeline_mode<synchronous>, transform_indices = @transform_3, window_bounds = array<i64: 1, 8>}, {transform_indices = @transform_4, window_bounds = array<i64: 8, 1>}, {transform_indices = @transform_5, window_bounds = array<i64: 1, 1, 128>}]} {
    %c0 = arith.constant 0 : index
    %c0_0 = arith.constant 0 : index
    %0 = vector.load %arg1[%c0, %c0_0] : memref<8x32xf32, #tpu.memory_space<vmem>>, vector<8x32xf32>
    %1 = arith.mulf %0, %0 : vector<8x32xf32>
    %cst = arith.constant dense<0.000000e+00> : vector<8xf32>
    %2 = vector.multi_reduction <add>, %1, %cst [1] : vector<8x32xf32> to vector<8xf32>
    %3 = vector.shape_cast %2 : vector<8xf32> to vector<8x1xf32>
    %c0_1 = arith.constant 0 : index
    %c0_2 = arith.constant 0 : index
    %4 = vector.load %arg2[%c0_1, %c0_2] : memref<32x8xf32, #tpu.memory_space<vmem>>, vector<32x8xf32>
    %cst_3 = arith.constant dense<0.000000e+00> : vector<8x8xf32>
    %5 = tpu.matmul %0, %4, %cst_3 {dimension_numbers = #tpu.dot_dimension_numbers<[1], [0], [0], [1], [0, 0, 1, 1], [], []>} : vector<8x32xf32>, vector<32x8xf32>, vector<8x8xf32> -> vector<8x8xf32>
    %c0_4 = arith.constant 0 : index
    %c0_5 = arith.constant 0 : index
    %6 = vector.load %arg3[%c0_4, %c0_5] : memref<1x8xf32, #tpu.memory_space<vmem>>, vector<1x8xf32>
    %7 = vector.broadcast %3 : vector<8x1xf32> to vector<8x8xf32>
    %8 = vector.broadcast %6 : vector<1x8xf32> to vector<8x8xf32>
    %9 = arith.addf %7, %8 : vector<8x8xf32>
    %10 = arith.subf %9, %5 : vector<8x8xf32>
    %c8_i32 = arith.constant 8 : i32
    %11 = arith.muli %arg0, %c8_i32 : i32
    %12 = tpu.iota {dimensions = array<i32: 0>} : vector<8x1xi32>
    %13 = vector.broadcast %11 : i32 to vector<8x1xi32>
    %14 = arith.addi %13, %12 : vector<8x1xi32>
    %c30_i32 = arith.constant 30 : i32
    %15 = vector.broadcast %c30_i32 : i32 to vector<8x1xi32>
    %16 = arith.cmpi slt, %14, %15 : vector<8x1xi32>
    %cst_6 = arith.constant 1.000000e+00 : f32
    %17 = vector.shape_cast %16 : vector<8x1xi1> to vector<8x1xi1>
    %18 = vector.broadcast %17 : vector<8x1xi1> to vector<8x8xi1>
    %19 = vector.broadcast %cst_6 : f32 to vector<8x8xf32>
    %20 = arith.select %18, %10, %19 : vector<8x8xi1>, vector<8x8xf32>
    %cst_7 = arith.constant 1.000000e-30 : f32
    %21 = vector.broadcast %cst_7 : f32 to vector<8x8xf32>
    %22 = arith.maximumf %20, %21 : vector<8x8xf32>
    %23 = tpu.reciprocal %22 {approx = true} : vector<8x8xf32> -> vector<8x8xf32>
    %24 = arith.mulf %22, %23 : vector<8x8xf32>
    %cst_8 = arith.constant 2.000000e+00 : f32
    %25 = vector.broadcast %cst_8 : f32 to vector<8x8xf32>
    %26 = arith.subf %25, %24 : vector<8x8xf32>
    %27 = arith.mulf %23, %26 : vector<8x8xf32>
    %28 = arith.mulf %27, %27 : vector<8x8xf32>
    %29 = arith.mulf %28, %28 : vector<8x8xf32>
    %30 = arith.mulf %27, %29 : vector<8x8xf32>
    %c0_9 = arith.constant 0 : index
    %c0_10 = arith.constant 0 : index
    %31 = vector.load %arg4[%c0_9, %c0_10] : memref<1x8xf32, #tpu.memory_space<vmem>>, vector<1x8xf32>
    %32 = vector.broadcast %31 : vector<1x8xf32> to vector<8x8xf32>
    %33 = arith.mulf %30, %32 : vector<8x8xf32>
    %cst_11 = arith.constant dense<0.000000e+00> : vector<8xf32>
    %34 = vector.multi_reduction <add>, %33, %cst_11 [1] : vector<8x8xf32> to vector<8xf32>
    %35 = vector.shape_cast %34 : vector<8xf32> to vector<8x1xf32>
    %cst_12 = arith.constant 1.000000e+00 : f32
    %36 = vector.broadcast %cst_12 : f32 to vector<1x8xf32>
    %37 = arith.subf %36, %31 : vector<1x8xf32>
    %38 = vector.broadcast %37 : vector<1x8xf32> to vector<8x8xf32>
    %39 = arith.mulf %30, %38 : vector<8x8xf32>
    %cst_13 = arith.constant dense<0.000000e+00> : vector<8xf32>
    %40 = vector.multi_reduction <add>, %39, %cst_13 [1] : vector<8x8xf32> to vector<8xf32>
    %41 = vector.shape_cast %40 : vector<8xf32> to vector<8x1xf32>
    %cst_14 = arith.constant -1.000000e-01 : f32
    %42 = vector.broadcast %cst_14 : f32 to vector<8x1xf32>
    %43 = math.powf %35, %42 : vector<8x1xf32>
    %cst_15 = arith.constant 0.000000e+00 : f32
    %44 = vector.broadcast %cst_15 : f32 to vector<8x1xf32>
    %45 = arith.subf %44, %43 : vector<8x1xf32>
    %cst_16 = arith.constant -1.000000e-01 : f32
    %46 = vector.broadcast %cst_16 : f32 to vector<8x1xf32>
    %47 = math.powf %41, %46 : vector<8x1xf32>
    %cst_17 = arith.constant 0.000000e+00 : f32
    %48 = vector.broadcast %cst_17 : f32 to vector<8x1xf32>
    %49 = arith.subf %48, %47 : vector<8x1xf32>
    %c0_18 = arith.constant 0 : index
    %c0_19 = arith.constant 0 : index
    %50 = vector.load %arg5[%c0_18, %c0_19] : memref<8x1xf32, #tpu.memory_space<vmem>>, vector<8x1xf32>
    %cst_20 = arith.constant 2.000000e+00 : f32
    %51 = vector.broadcast %cst_20 : f32 to vector<8x1xf32>
    %52 = arith.mulf %51, %50 : vector<8x1xf32>
    %cst_21 = arith.constant 1.000000e+00 : f32
    %53 = vector.broadcast %cst_21 : f32 to vector<8x1xf32>
    %54 = arith.subf %53, %52 : vector<8x1xf32>
    %55 = arith.subf %49, %45 : vector<8x1xf32>
    %56 = arith.mulf %54, %55 : vector<8x1xf32>
    %cst_22 = arith.constant 0.000000e+00 : f32
    %57 = vector.broadcast %cst_22 : f32 to vector<8x1xf32>
    %58 = arith.maximumf %56, %57 : vector<8x1xf32>
    %59 = math.absf %56 : vector<8x1xf32>
    %cst_23 = arith.constant 0.000000e+00 : f32
    %60 = vector.broadcast %cst_23 : f32 to vector<8x1xf32>
    %61 = arith.subf %60, %59 : vector<8x1xf32>
    %62 = math.exp %61 : vector<8x1xf32>
    %cst_24 = arith.constant 1.000000e+00 : f32
    %63 = vector.broadcast %cst_24 : f32 to vector<8x1xf32>
    %64 = arith.addf %63, %62 : vector<8x1xf32>
    %65 = math.log %64 : vector<8x1xf32>
    %66 = arith.addf %58, %65 : vector<8x1xf32>
    %cst_25 = arith.constant 0.000000e+00 : f32
    %67 = vector.broadcast %cst_25 : f32 to vector<8x1xf32>
    %68 = arith.select %16, %66, %67 : vector<8x1xi1>, vector<8x1xf32>
    %69 = vector.shape_cast %68 : vector<8x1xf32> to vector<1x8x1xf32>
    %cst_26 = arith.constant dense<0.000000e+00> : vector<1xf32>
    %70 = vector.multi_reduction <add>, %69, %cst_26 [1, 2] : vector<1x8x1xf32> to vector<1xf32>
    %71 = vector.shape_cast %70 : vector<1xf32> to vector<1x1x1xf32>
    %72 = vector.extract %71[0, 0, 0] : f32 from vector<1x1x1xf32>
    %cst_27 = arith.constant 0.0166666675 : f32
    %73 = arith.mulf %cst_27, %72 : f32
    %74 = vector.broadcast %73 : f32 to vector<1x1x128xf32>
    %c0_28 = arith.constant 0 : index
    %c0_29 = arith.constant 0 : index
    %c0_30 = arith.constant 0 : index
    %75 = vector.load %arg6[%c0_28, %c0_29, %c0_30] : memref<1x1x128xf32, #tpu.memory_space<vmem>>, vector<1x1x128xf32>
    tpu.vector_store %arg6[%c0_28, %c0_29, %c0_30], %74 {strides = array<i32>} : memref<1x1x128xf32, #tpu.memory_space<vmem>>, vector<1x1x128xf32>,
    return
  }
  func.func @transform_0(%arg0: i32) -> (i32, i32) {
    %c0_i32 = arith.constant 0 : i32
    %c0_i32_0 = arith.constant 0 : i32
    return %arg0, %c0_i32 : i32, i32
  }
  func.func @transform_1(%arg0: i32) -> (i32, i32) {
    %c0_i32 = arith.constant 0 : i32
    %c0_i32_0 = arith.constant 0 : i32
    %c0_i32_1 = arith.constant 0 : i32
    return %c0_i32, %c0_i32_0 : i32, i32
  }
  func.func @transform_2(%arg0: i32) -> (i32, i32) {
    %c0_i32 = arith.constant 0 : i32
    %c0_i32_0 = arith.constant 0 : i32
    %c0_i32_1 = arith.constant 0 : i32
    return %c0_i32, %c0_i32_0 : i32, i32
  }
  func.func @transform_3(%arg0: i32) -> (i32, i32) {
    %c0_i32 = arith.constant 0 : i32
    %c0_i32_0 = arith.constant 0 : i32
    %c0_i32_1 = arith.constant 0 : i32
    return %c0_i32, %c0_i32_0 : i32, i32
  }
  func.func @transform_4(%arg0: i32) -> (i32, i32) {
    %c0_i32 = arith.constant 0 : i32
    %c0_i32_0 = arith.constant 0 : i32
    return %arg0, %c0_i32 : i32, i32
  }
  func.func @transform_5(%arg0: i32) -> (i32, i32, i32) {
    %c0_i32 = arith.constant 0 : i32
    %c0_i32_0 = arith.constant 0 : i32
    %c0_i32_1 = arith.constant 0 : i32
    return %arg0, %c0_i32, %c0_i32_0 : i32, i32, i32
  }
}

</mosaic_0001>

<bundles_post_ra>
// kernel: tpu_custom_call.1
= control target key start
LH: loop header
LB: loop body
LE: loop exit
PB: predicated region body
PF: predicated region fallthrough
CT: control target
= control target key end

     0   :  { %10 = vsyncpa [#allocation3], 0  ;;  %s863_s0 = inlined_call_operand.vmem [shape: f32[30,32], index: 0, kind: input, shape index: {}]   ;;  %s864_s1 = inlined_call_operand.vmem [shape: f32[32,8], index: 1, kind: input, shape index: {}]   ;;  %s865_s2 = inlined_call_operand.vmem [shape: f32[1,8], index: 2, kind: input, shape index: {}]   ;;  %s866_s3 = inlined_call_operand.vmem [shape: f32[1,8], index: 3, kind: input, shape index: {}]   ;;  %s867_s4 = inlined_call_operand.vmem [shape: f32[32,1], index: 4, kind: input, shape index: {}]   ;;  %s868_s5 = inlined_call_operand.hbm [shape: f32[4,1,128], index: 5, kind: output, shape index: {}]  }
   0x1   :  { %12 = vsyncpa [#allocation3 + $0x1], 0  ;;  %s727_s18 = smov 0   ;;  %s729_s19 = smov 0  }
   0x2   :  { %s731_s20 = smov 0   ;;  %s733_s21 = smov 0  }
   0x3 LB: > { %s748_s22 = sadd.s32 4294967295, %s691_s21   ;;  %s481_s23 = sadd.s32 4294967294, %s691_s21   ;;  %s691_s21 = sphi %s733_s21, %s874_s21   ;;  %s687_s20 = sphi %s731_s20, %s873_s20   ;;  %s683_s19 = sphi %s729_s19, %s872_s19   ;;  %s679_s18 = sphi %s727_s18, %s871_s18  }
   0x4   : > { %s752_s24 = sadd.s32 1, %s691_s21   ;;  %s140_s25 = sadd.s32 1, %s687_s20 }
   0x5   : > { %s137_s26 = ssub.s32 %s691_s21, %s752_s24  ;;  %p150_p0 = scmp.ne.s32.totalorder %s687_s20, %s683_s19 }
   0x6   : > { %p138_p1 = scmp.eq.s32.totalorder %s137_s26, 0  ;;  %p151_p2 = scmp.eq.s32.totalorder %s748_s22, 3 }
   0x7   : > { %p156_p3 = scmp.ne.s32.totalorder %s683_s19, %s679_s18  ;;  %p157_p4 = scmp.eq.s32.totalorder %s481_s23, 3 }
   0x8   : > { %s763_s27 = scalar_select %p138_p1, %s687_s20, %s140_s25  }
   0x9   : > { %p765_p5 = por %p151_p2, %p150_p0  ;;  %p769_p6 = por %p157_p4, %p156_p3 }
   0xa   : > { %p484_p7 = scmp.ge.s32.totalorder %s691_s21, 1  ;;  %p198_p8 = scmp.lt.s32.totalorder %s691_s21, 5 }
   0xc   : > { %p199_p9 = pnand %p484_p7, %p198_p8 }
   0xd   : > { %v242_v0 = vld [vmem:[%s864_s1] sm:$0xff] (!%p199_p9)  ;;  %v243_v1 = vld [vmem:[%s864_s1 + $0x8] sm:$0xff] (!%p199_p9)  ;;  %v244_v2 = vld [vmem:[%s864_s1 + $0x10] sm:$0xff] (!%p199_p9)  ;;  %v693_v3 = vmov (!%p199_p9), 0.0|0.0   ;;  %vm694_vm0 = vmmov (!%p199_p9), 0   ;;  %v695_v6 = vmov (!%p199_p9), 0.0   ;;  %v329_v11 = vlaneseq (!%p199_p9) }
   0xe   : > { %202 = sbr.rel (%p199_p9) target bundleno = 706 (0x2c2), region = 40  ;;  %509 = vmatprep.subr.bf16.mxu0 (!%p199_p9), %v693_v3  ;;  %v510_v4 = vpack.c.bf16 (!%p199_p9), %v243_v1, %v242_v0  ;;  %v245_v5 = vld [vmem:[%s864_s1 + $0x18] sm:$0xff] (!%p199_p9)  ;;  %506 = vmatprep.mubr.msk.f32.mxu0 (!%p199_p9), %vm694_vm0, %v695_v6  ;;  %p228_p10 = scmp.lt.s32.totalorder (!%p199_p9), %s748_s22, 3  ;;  %vm238_vm1 = vcmask (!%p199_p9), 261120   ;;  %v488_v14 = vld [vmem:[%s865_s2] ss:$0 sm:$0xff] (!%p199_p9) }
   0xf   : > { %v513_v7 = vpack.c.bf16 (!%p199_p9), %v245_v5, %v244_v2  ;;  %s489_s23 = sshll.u32 (!%p199_p9), %s748_s22, 3  ;;  %v330_v12 = vshrl.u32 (!%p199_p9), %v329_v11, 7  ;;  %v345_v25 = vld [vmem:[%s866_s3] sm:$0x1] (!%p199_p9)  ;;  %vm353_vm3 = vcmask (!%p199_p9), 64512   ;;  %vm387_vm14 = vcmask (!%p199_p9), 7168  }
  0x10   : > { %511 = vmatpush3.bf16.msra.mxu0 (!%p199_p9), %v510_v4  ;;  %v331_v13 = vstv (!%p199_p9), %s489_s23  ;;  %v357_v29 = vsub.f32 (!%p199_p9), 1.0, %v345_v25  ;;  %s226_s10 = sand.u32 (!%p199_p9), 1, %s683_s19  }
  0x11   : > { %512 = vmatprep.subr.bf16.mxu0 (!%p199_p9), %v693_v3  ;;  %v801_v16 = vadd.s32 (!%p199_p9), %v331_v13, %v330_v12  ;;  %v349_v28 = vsub.s32 (!%p199_p9), 0, %v330_v12  ;;  %s227_s11 = scalar_lea.vmem (!%p199_p9), [#allocation2], %s226_s10  ;;  %s402_s25 = scalar_lea.sflag (!%p199_p9), [#allocation3], %s226_s10 }
  0x12   : > { %s414_s12 = sshll.u32 (!%p199_p9), %s227_s11, 4  ;;  %s823_s12 = int_to_ptr.vmem [resolvable:$true] %s414_s12 }
  0x13   : > { %vm333_vm2 = vcmp.lt.s32.totalorder (!%p199_p9), %v801_v16, 30  ;;  %v362_v32 = vrot.slane (!%p199_p9), %v357_v29, %v349_v28  ;;  %v350_v33 = vrot.slane (!%p199_p9), %v345_v25, %v349_v28  ;;  %s629_s26 = scalar_lea.vmem (!%p199_p9), %s823_s12, 16 }
  0x14   : > { %514 = vmatpush3.bf16.msra.mxu0 (!%p199_p9), %v513_v7  ;;  %p630_p11 = scmp.ne.s32.totalorder (!%p199_p9), %s823_s12, %s629_s26 }
  0x15   : > { %s789_s13 = scalar_select %p228_p10, %s748_s22, 3 }
  0x16   : > { %p631_p12 = pnand %p630_p11, %p765_p5 }
  0x17   : > { %s485_s14 = sshll.u32 %s789_s13, 3  ;;  %s490_s13 = sshll.u32 %s748_s22, 4 }
  0x18   : > { %s231_s17 = scalar_lea.vmem %s863_s0, %s485_s14  ;;  %s235_s9 = scalar_lea.vmem %s867_s4, %s485_s14 }
  0x19   : > { %v236_v8 = vld [vmem:[%s231_s17] sm:$0xff]  ;;  %s821_s23 = scalar_lea.hbm %s868_s5, %s490_s13  ;;  %p632_p13 = pneg %p631_p12 }
  0x1a   : > { %v237_v9 = vmul.f32 %v236_v8, %v236_v8  ;;  %507 = vmatmul.mubr.msk.f32.vlgmr.msra.gmra.mrb[0].mxu0 %vm238_vm1, %v236_v8  ;;  %v372_v47 = vld [vmem:[%s235_s9] sm:$0xff]  ;;  %s696_s22 = smov [#allocation2]  }
  0x1b   : > { %v373_v50 = vmul.f32 2.0, %v372_v47  ;;  %s633_s30 = sshll.u32 %s696_s22, 4  ;;  %s634_s30 = int_to_ptr.vmem [resolvable:$false] %s633_s30 }
  0x1c   : > { %v239_v10 = vsel %vm238_vm1, %v237_v9, 0.0  ;;  %s635_s6 = scalar_lea.vmem %s634_s30, 32  ;;  %p636_p0 = scmp.lt.s32.totalorder %s823_s12, %s634_s30 }
  0x1d   : > { %240 = vadd.xlane.f32.xlu0 %v239_v10  ;;  %v374_v62 = vsub.f32 1.0, %v373_v50  ;;  %p637_p1 = scmp.lt.s32.totalorder %s635_s6, %s629_s26 }
  0x1f   : > { %p638_p2 = por %p637_p1, %p636_p0 }
  0x21   : > { %p639_p3 = pnand %p638_p2, %p632_p13 }
  0xaa   : > { %v241_v15 = vpop.xlane.xlu0 %240 }
  0xab   : > { %v326_v17 = vadd.f32 %v488_v14, %v241_v15 }
  0xed   : > { %v315_v18 = vpop.f32.mrb[0].mxu0 }
  0xee   : > { %v327_v19 = vsub.f32 %v326_v17, %v315_v18  ;;  %v508_v20 = vpop.f32.mrb[1].mxu0 }
  0xf0   : > { %v336_v21 = vsel %vm333_vm2, %v327_v19, 1.0 }
  0xf1   : > { %v337_v22 = vmax.f32 %v336_v21, 1e-30 }
  0xf3   : > { %615 = vrcp.f32 %v337_v22 }
  0xfd   : > { %v616_v23 = vpop.eup %615 }
  0xfe   : > { %v339_v24 = vmul.f32 %v616_v23, %v337_v22 }
 0x100   : > { %v340_v26 = vsub.f32 2.0, %v339_v24 }
 0x102   : > { %v341_v27 = vmul.f32 %v616_v23, %v340_v26 }
 0x104   : > { %v342_v30 = vmul.f32 %v341_v27, %v341_v27 }
 0x106   : > { %v343_v31 = vmul.f32 %v342_v30, %v342_v30 }
 0x108   : > { %v344_v34 = vmul.f32 %v343_v31, %v341_v27 }
 0x10a   : > { %v364_v35 = vmul.f32 %v362_v32, %v344_v34  ;;  %v352_v36 = vmul.f32 %v350_v33, %v344_v34 }
 0x10c   : > { %v365_v37 = vsel %vm353_vm3, %v364_v35, 0.0  ;;  %v354_v38 = vsel %vm353_vm3, %v352_v36, 0.0 }
 0x10d   : > { %366 = vadd.xlane.f32.xlu1 %v365_v37  ;;  %355 = vadd.xlane.f32.xlu0 %v354_v38 }
 0x19a   : > { %v367_v39 = vpop.xlane.xlu1 %366  ;;  %v356_v40 = vpop.xlane.xlu0 %355 }
 0x19b   : > { %v547_v41 = vand.u32 2147483647, %v367_v39  ;;  %v519_v42 = vand.u32 2147483647, %v356_v40  ;;  %vm551_vm4 = vcmp.lt.f32.partialorder %v367_v39, 0  ;;  %vm552_vm5 = vcmp.eq.f32.partialorder %v367_v39, 0 }
 0x19c   : > { %vm523_vm6 = vcmp.lt.f32.partialorder %v356_v40, 0  ;;  %vm524_vm8 = vcmp.eq.f32.partialorder %v356_v40, 0  ;;  %vm566_vm9 = vcmp.ne.f32.partialorder %v367_v39, %v367_v39  ;;  %vm553_vm11 = vcmp.eq.f32.partialorder %v367_v39, 1065353216 }
 0x19d   : > { %617 = vlog2.f32 %v547_v41  ;;  %vm556_vm7 = vcmp.eq.f32.partialorder %v547_v41, 2139095040  ;;  %vm528_vm10 = vcmp.eq.f32.partialorder %v519_v42, 2139095040  ;;  %vm538_vm12 = vcmp.ne.f32.partialorder %v356_v40, %v356_v40 }
 0x19e   : > { %619 = vlog2.f32 %v519_v42  ;;  %vm525_vm13 = vcmp.eq.f32.partialorder %v356_v40, 1065353216 }
 0x1a7   : > { %v618_v43 = vpop.eup %617 }
 0x1a8   : > { %v620_v44 = vpop.eup %619  ;;  %v549_v45 = vmul.f32 -0.1, %v618_v43 }
 0x1a9   : > { %v521_v46 = vmul.f32 -0.1, %v620_v44 }
 0x1aa   : > { %621 = vpow2.f32 %v549_v45 }
 0x1ab   : > { %623 = vpow2.f32 %v521_v46 }
 0x1b4   : > { %v622_v48 = vpop.eup %621 }
 0x1b5   : > { %v624_v49 = vpop.eup %623  ;;  %v557_v51 = vsel %vm551_vm4, 2143289344, %v622_v48 }
 0x1b6   : > { %v558_v52 = vsel %vm552_vm5, 2139095040, %v557_v51  ;;  %v529_v53 = vsel %vm523_vm6, 2143289344, %v624_v49 }
 0x1b7   : > { %v565_v54 = vsel %vm556_vm7, 0, %v558_v52  ;;  %v530_v55 = vsel %vm524_vm8, 2139095040, %v529_v53 }
 0x1b8   : > { %v569_v56 = vsel %vm566_vm9, 2143289344, %v565_v54  ;;  %v537_v57 = vsel %vm528_vm10, 0, %v530_v55 }
 0x1b9   : > { %v570_v58 = vsel %vm553_vm11, 1065353216, %v569_v56  ;;  %v541_v59 = vsel %vm538_vm12, 2143289344, %v537_v57 }
 0x1ba   : > { %v371_v60 = vsub.f32 0.0, %v570_v58  ;;  %v542_v61 = vsel %vm525_vm13, 1065353216, %v541_v59 }
 0x1bb   : > { %v369_v63 = vsub.f32 0.0, %v542_v61 }
 0x1bd   : > { %v375_v0 = vsub.f32 %v371_v60, %v369_v63 }
 0x1bf   : > { %v376_v1 = vmul.f32 %v375_v0, %v374_v62 }
 0x1c1   : > { %v378_v2 = vand.u32 2147483647, %v376_v1  ;;  %v377_v8 = vmax.f32 %v376_v1, 0.0 }
 0x1c3   : > { %v379_v3 = vsub.f32 0.0, %v378_v2 }
 0x1c5   : > { %v380_v4 = vmul.f32 1.442695, %v379_v3 }
 0x1c7   : > { %625 = vpow2.f32 %v380_v4 }
 0x1d1   : > { %v626_v5 = vpop.eup %625 }
 0x1d2   : > { %v382_v6 = vadd.f32 1.0, %v626_v5 }
 0x1d4   : > { %627 = vlog2.f32 %v382_v6 }
 0x1de   : > { %v628_v7 = vpop.eup %627 }
 0x1df   : > { %v384_v9 = vmul.f32 0.6931472, %v628_v7 }
 0x1e1   : > { %v385_v10 = vadd.f32 %v384_v9, %v377_v8 }
 0x1e3   : > { %v386_v11 = vsel %vm333_vm2, %v385_v10, 0.0 }
 0x1e4   : > { %v388_v12 = vsel %vm387_vm14, %v386_v11, 0.0 }
 0x1e5   : > { %389 = vadd.xlane.f32.xlu1 %v388_v12 }
 0x272   : > { %v390_v13 = vpop.xlane.xlu1 %389 }
 0x273   : > { %v391_v14 = vrot.slane %v390_v13, 4 }
 0x275   : > { %v392_v15 = vadd.f32 %v391_v14, %v390_v13 }
 0x277   : > { %v393_v17 = vrot.slane %v392_v15, 2 }
 0x279   : > { %v394_v18 = vadd.f32 %v393_v17, %v392_v15 }
 0x27b   : > { %v395_v19 = vrot.slane %v394_v18, 1 }
 0x27d   : > { %v396_v20 = vadd.f32 %v395_v19, %v394_v18 }
 0x27f   : > { %571 = vpush %v396_v20 }
 0x2b0   : > { %s572_s14 = spop %571 }
 0x2b1   : > { %s398_s15 = smul.f32 0.016666668, %s572_s14 }
 0x2b3   : > { %v399_v16 = vstv %s398_s15 }
 0x2b4   : > { %400 = vst [vmem:[%s227_s11] sm:$0x1] %v399_v16 }
 0x2b5   : > { %642 = shalt.err (!%p639_p3)
}
 0x2b6   : > { %s643_s7 = scalar_lea.hbm %s821_s23, 16  ;;  %s647_s10 = scalar_lea.hbm %s868_s5, 64 }
 0x2b7   : > { %p644_p4 = scmp.ne.s32.totalorder %s821_s23, %s643_s7  ;;  %p648_p9 = scmp.lt.u32.totalorder %s821_s23, %s868_s5 }
 0x2b8   : > { %p649_p10 = scmp.lt.u32.totalorder %s647_s10, %s643_s7  ;;  %p651_p12 = scmp.lt.u32.totalorder %s643_s7, %s821_s23 }
 0x2b9   : > { %p645_p7 = pnand %p644_p4, %p765_p5 }
 0x2ba   : > { %p650_p11 = por %p649_p10, %p648_p9 }
 0x2bb   : > { %p646_p8 = pneg %p645_p7 }
 0x2bc   : > { %p652_p13 = por %p651_p12, %p650_p11 }
 0x2be   : > { %p653_p0 = pnand %p652_p13, %p646_p8 }
 0x2c0   : > { %656 = shalt.err (!%p653_p0)
}
 0x2c1   : > { %573 = dma.vmem_to_hbm [thread:$0]  (%p765_p5), %s823_s12, 16, %s821_s23, %s402_s25  }
 0x2c2 PF: > { %p579_p1 = scmp.ge.s32.totalorder %s691_s21, 2  ;;  %s426_s14 = sand.u32 1, %s679_s18  }
 0x2c3   : > { %s427_s15 = scalar_lea.sflag [#allocation3], %s426_s14 }
 0x2c4   : > { %p576_p2 = pnand %p579_p1, %p769_p6 }
 0x2c6   : > { %674 = dma.done.wait (!%p576_p2), %s427_s15, 16  }
 0x2c7   : > { %676 = vsyncadd (!%p576_p2), %s427_s15, 4294967280  ;;  %p15_p3 = scmp.ge.s32.totalorder %s752_s24, 6   ;;  %s871_s18 = smov %s683_s19 }
 0x2c8   : > { %s872_s19 = smov %s687_s20  ;;  %s873_s20 = smov %s763_s27 }
 0x2c9   : > { %s874_s21 = smov %s752_s24  ;;  %17 = sbr.rel (!%p15_p3) target bundleno = 3 (0x3), region = 78 }
 0x2d0   :  { %431 = vsyncpa [#allocation3], 1 }
 0x2d1   :  { %433 = vsyncpa [#allocation3 + $0x1], 1 }

</bundles_post_ra>
